<compile_context>
chip_gen: v7x
topology: tpu7x:2x2x1
jax: 0.10.0
libtpu: 0.0.40
codegen_flags: <defaults>
</compile_context>

<pallas_src>
import functools

import jax
import jax.numpy as jnp
from jax import lax
from jax.experimental import pallas as pl
from jax.experimental.pallas import tpu as pltpu

_NEG = -1e30           # mask value for padded class columns
_VMEM_LIMIT = 48 * 1024 * 1024


def _round_up(v, m):
    return (v + m - 1) // m * m


# ----------------------- teacher forward (tiled matmul) ----------------------

def _teacher_linear_kernel(x_ref, w_ref, b_ref, o_ref, acc_ref):
    k = pl.program_id(2)

    @pl.when(k == 0)
    def _init():
        acc_ref[...] = jnp.zeros_like(acc_ref)

    acc_ref[...] += jnp.dot(x_ref[...], w_ref[...],
                            preferred_element_type=jnp.float32)

    @pl.when(k == pl.num_programs(2) - 1)
    def _finalize():
        o_ref[...] = (acc_ref[...] + b_ref[...].astype(jnp.float32)).astype(o_ref.dtype)


def teacher_forward(x, w, b, *, tm=128, tn=128, tk=256, mxu_dtype=jnp.bfloat16):
    """logits = x @ W + b, tiled for the MXU (bf16 inputs, f32 accumulation)."""
    B, H = x.shape
    H2, C = w.shape
    assert H == H2
    b = b.reshape(1, C)

    tm = min(tm, _round_up(B, 8))
    tn = min(tn, _round_up(C, 128))
    tk = min(tk, _round_up(H, 128))
    Bp, Cp, Hp = _round_up(B, tm), _round_up(C, tn), _round_up(H, tk)

    xp = jnp.pad(x, ((0, Bp - B), (0, Hp - H))).astype(mxu_dtype)
    wp = jnp.pad(w, ((0, Hp - H), (0, Cp - C))).astype(mxu_dtype)
    bp = jnp.pad(b, ((0, 0), (0, Cp - C))).astype(jnp.float32)

    grid = (Bp // tm, Cp // tn, Hp // tk)
    flops = 2 * Bp * Cp * Hp
    bytes_accessed = (xp.size * xp.dtype.itemsize + wp.size * wp.dtype.itemsize
                      + bp.size * 4 + Bp * Cp * 4)

    out = pl.pallas_call(
        _teacher_linear_kernel,
        out_shape=jax.ShapeDtypeStruct((Bp, Cp), jnp.float32),
        grid_spec=pltpu.PrefetchScalarGridSpec(
            num_scalar_prefetch=0,
            grid=grid,
            in_specs=[
                pl.BlockSpec((tm, tk), lambda i, j, k: (i, k)),
                pl.BlockSpec((tk, tn), lambda i, j, k: (k, j)),
                pl.BlockSpec((1, tn), lambda i, j, k: (0, j)),
            ],
            out_specs=pl.BlockSpec((tm, tn), lambda i, j, k: (i, j)),
            scratch_shapes=[pltpu.VMEM((tm, tn), jnp.float32)],
        ),
        compiler_params=pltpu.CompilerParams(
            dimension_semantics=("parallel", "parallel", "arbitrary"),
            vmem_limit_bytes=_VMEM_LIMIT,
        ),
        cost_estimate=pl.CostEstimate(flops=flops, transcendentals=0,
                                      bytes_accessed=bytes_accessed),
    )(xp, wp, bp)
    return out[:B, :C]


# ------------------------- distillation loss (batch-tiled) -------------------

def _distill_loss_kernel(s_ref, t_ref, o_ref, acc_ref, *,
                         inv_t, final_scale, b_valid, c_valid):
    i = pl.program_id(0)

    @pl.when(i == 0)
    def _init():
        acc_ref[0, 0] = 0.0

    tb, cp = s_ref.shape
    col_ok = lax.broadcasted_iota(jnp.int32, (tb, cp), 1) < c_valid
    row_ok = (i * tb + lax.broadcasted_iota(jnp.int32, (tb, 1), 0)) < b_valid

    s = jnp.where(col_ok, s_ref[...].astype(jnp.float32) * inv_t, _NEG)
    t = jnp.where(col_ok, t_ref[...].astype(jnp.float32) * inv_t, _NEG)

    # log_softmax(student / T)
    s_max = jnp.max(s, axis=-1, keepdims=True)
    s_shift = s - s_max
    log_p_s = s_shift - jnp.log(jnp.sum(jnp.exp(s_shift), axis=-1, keepdims=True))

    # softmax(teacher / T) and its log
    t_max = jnp.max(t, axis=-1, keepdims=True)
    t_shift = t - t_max
    t_exp = jnp.exp(t_shift)
    t_sum = jnp.sum(t_exp, axis=-1, keepdims=True)
    p_t = t_exp * pl.reciprocal(t_sum, approx=True)   # EUP, ~free
    log_p_t = t_shift - jnp.log(t_sum)

    kl_rows = jnp.sum(p_t * (log_p_t - log_p_s), axis=-1, keepdims=True)
    kl_rows = jnp.where(row_ok, kl_rows, 0.0)
    acc_ref[0, 0] += jnp.sum(kl_rows)

    @pl.when(i == pl.num_programs(0) - 1)
    def _fin():
        o_ref[0, 0] = acc_ref[0, 0] * final_scale


def _distill_loss_pallas(student_logits, teacher_logits, temperature, alpha, tb=256):
    B, C = student_logits.shape
    tb = min(tb, _round_up(B, 8))
    Bp = _round_up(B, tb)
    Cp = _round_up(C, 128)

    sp = jnp.pad(student_logits.astype(jnp.float32), ((0, Bp - B), (0, Cp - C)))
    tp = jnp.pad(teacher_logits.astype(jnp.float32), ((0, Bp - B), (0, Cp - C)))

    kern = functools.partial(
        _distill_loss_kernel,
        inv_t=1.0 / float(temperature),
        final_scale=float(temperature) ** 2 * float(alpha) / float(B),
        b_valid=B, c_valid=C,
    )
    out = pl.pallas_call(
        kern,
        out_shape=jax.ShapeDtypeStruct((1, 1), jnp.float32),
        grid_spec=pltpu.PrefetchScalarGridSpec(
            num_scalar_prefetch=0,
            grid=(Bp // tb,),
            in_specs=[
                pl.BlockSpec((tb, Cp), lambda i: (i, 0)),
                pl.BlockSpec((tb, Cp), lambda i: (i, 0)),
            ],
            out_specs=pl.BlockSpec(memory_space=pltpu.MemorySpace.SMEM),
            scratch_shapes=[pltpu.SMEM((1, 1), jnp.float32)],
        ),
        compiler_params=pltpu.CompilerParams(
            dimension_semantics=("arbitrary",),   # scalar reduction over batch tiles
            vmem_limit_bytes=_VMEM_LIMIT,
        ),
        cost_estimate=pl.CostEstimate(flops=10 * Bp * Cp,
                                      transcendentals=2 * Bp * Cp,
                                      bytes_accessed=2 * Bp * Cp * 4 + 4),
    )(sp, tp)
    return out[0, 0]


@functools.partial(jax.custom_vjp, nondiff_argnums=(2, 3))
def distill_loss(student_logits, teacher_logits, temperature, alpha):
    return _distill_loss_pallas(student_logits, teacher_logits, temperature, alpha)


def _distill_loss_fwd(student_logits, teacher_logits, temperature, alpha):
    loss = _distill_loss_pallas(student_logits, teacher_logits, temperature, alpha)
    return loss, (student_logits, teacher_logits)


def _distill_loss_bwd(temperature, alpha, res, g):
    s, t = res
    T = float(temperature)
    B = s.shape[0]
    p_s = jax.nn.softmax(s.astype(jnp.float32) / T, axis=-1)
    p_t = jax.nn.softmax(t.astype(jnp.float32) / T, axis=-1)
    gs = (g * float(alpha) * T / B) * (p_s - p_t)
    # Teacher is frozen (buffers, no-grad in the PyTorch wrapper) -> zero grad.
    return gs.astype(s.dtype), jnp.zeros_like(t)


distill_loss.defvjp(_distill_loss_fwd, _distill_loss_bwd)


# --------------- fused teacher-matmul + distill loss (no HBM round trip) -----

def _fused_teacher_distill_kernel(x_ref, w_ref, b_ref, s_ref,
                                  t_out_ref, loss_ref, acc_ref, kl_ref, *,
                                  inv_t, final_scale, b_valid, c_valid):
    i = pl.program_id(0)
    k = pl.program_id(1)

    @pl.when(jnp.logical_and(i == 0, k == 0))
    def _init_loss():
        kl_ref[0, 0] = 0.0

    @pl.when(k == 0)
    def _init_acc():
        acc_ref[...] = jnp.zeros_like(acc_ref)

    acc_ref[...] += jnp.dot(x_ref[...], w_ref[...],
                            preferred_element_type=jnp.float32)

    @pl.when(k == pl.num_programs(1) - 1)
    def _finalize():
        t_logits = acc_ref[...] + b_ref[...].astype(jnp.float32)
        t_out_ref[...] = t_logits.astype(t_out_ref.dtype)

        tm, cp = t_logits.shape
        col_ok = lax.broadcasted_iota(jnp.int32, (tm, cp), 1) < c_valid
        row_ok = (i * tm + lax.broadcasted_iota(jnp.int32, (tm, 1), 0)) < b_valid

        t = jnp.where(col_ok, t_logits * inv_t, _NEG)
        s = jnp.where(col_ok, s_ref[...].astype(jnp.float32) * inv_t, _NEG)

        s_max = jnp.max(s, axis=-1, keepdims=True)
        s_shift = s - s_max
        log_p_s = s_shift - jnp.log(jnp.sum(jnp.exp(s_shift), axis=-1, keepdims=True))

        t_max = jnp.max(t, axis=-1, keepdims=True)
        t_shift = t - t_max
        t_exp = jnp.exp(t_shift)
        t_sum = jnp.sum(t_exp, axis=-1, keepdims=True)
        p_t = t_exp * pl.reciprocal(t_sum, approx=True)
        log_p_t = t_shift - jnp.log(t_sum)

        kl_rows = jnp.sum(p_t * (log_p_t - log_p_s), axis=-1, keepdims=True)
        kl_rows = jnp.where(row_ok, kl_rows, 0.0)
        kl_ref[0, 0] += jnp.sum(kl_rows)

        # Written every batch tile; the final grid step leaves the total.
        loss_ref[0, 0] = kl_ref[0, 0] * final_scale


def fused_teacher_forward_and_loss(x, w, b, student_logits, *, temperature, alpha,
                                   tm=128, tk=256, mxu_dtype=jnp.bfloat16):
    B, H = x.shape
    _, C = w.shape
    b = b.reshape(1, C)

    tm = min(tm, _round_up(B, 8))
    tk = min(tk, _round_up(H, 128))
    Cp = _round_up(C, 128)
    Bp = _round_up(B, tm)
    Hp = _round_up(H, tk)

    xp = jnp.pad(x, ((0, Bp - B), (0, Hp - H))).astype(mxu_dtype)
    wp = jnp.pad(w, ((0, Hp - H), (0, Cp - C))).astype(mxu_dtype)
    bp = jnp.pad(b, ((0, 0), (0, Cp - C))).astype(jnp.float32)
    sp = jnp.pad(student_logits.astype(jnp.float32), ((0, Bp - B), (0, Cp - C)))

    kern = functools.partial(
        _fused_teacher_distill_kernel,
        inv_t=1.0 / float(temperature),
        final_scale=float(temperature) ** 2 * float(alpha) / float(B),
        b_valid=B, c_valid=C,
    )
    logits_p, loss = pl.pallas_call(
        kern,
        out_shape=(jax.ShapeDtypeStruct((Bp, Cp), jnp.float32),
                   jax.ShapeDtypeStruct((1, 1), jnp.float32)),
        grid_spec=pltpu.PrefetchScalarGridSpec(
            num_scalar_prefetch=0,
            grid=(Bp // tm, Hp // tk),
            in_specs=[
                pl.BlockSpec((tm, tk), lambda i, k: (i, k)),
                pl.BlockSpec((tk, Cp), lambda i, k: (k, 0)),
                pl.BlockSpec((1, Cp), lambda i, k: (0, 0)),
                pl.BlockSpec((tm, Cp), lambda i, k: (i, 0)),
            ],
            out_specs=(
                pl.BlockSpec((tm, Cp), lambda i, k: (i, 0)),
                pl.BlockSpec(memory_space=pltpu.MemorySpace.SMEM),
            ),
            scratch_shapes=[pltpu.VMEM((tm, Cp), jnp.float32),
                            pltpu.SMEM((1, 1), jnp.float32)],
        ),
        compiler_params=pltpu.CompilerParams(
            # batch axis carries the scalar KL accumulation -> arbitrary
            dimension_semantics=("arbitrary", "arbitrary"),
            vmem_limit_bytes=_VMEM_LIMIT,
        ),
        cost_estimate=pl.CostEstimate(
            flops=2 * Bp * Cp * Hp + 10 * Bp * Cp,
            transcendentals=2 * Bp * Cp,
            bytes_accessed=(xp.size * xp.dtype.itemsize + wp.size * wp.dtype.itemsize
                            + sp.size * 4 + Bp * Cp * 4)),
    )(xp, wp, bp, sp)
    return logits_p[:B, :C], loss[0, 0]


# -------------------------------- wrapper class -------------------------------

class TeacherWrapperPallas:
    """Mirrors TeacherWrapper: frozen teacher forward + cached output +
    temperature-scaled KL distillation loss (batchmean * T^2 * ce_alpha)."""

    def __init__(self, teacher_params, *, ce_alpha=0.0, ce_temperature=1.0):
        # convert_parameters_to_buffers(): teacher params are frozen constants.
        self.w = jax.lax.stop_gradient(teacher_params["w"])
        self.b = jax.lax.stop_gradient(teacher_params["b"])
        self.ce_alpha = ce_alpha
        self.ce_temperature = ce_temperature
        self._output = None

    def forward(self, x):
        # keep_gradients=False -> no grad through the teacher
        self._output = jax.lax.stop_gradient(teacher_forward(x, self.w, self.b))
        return self._output

    __call__ = forward

    def compute_cross_entropy_loss(self, student_outputs, teacher_outputs):
        return distill_loss(student_outputs, teacher_outputs,
                            self.ce_temperature, 1.0)

    def compute_distill_loss_callback(self, student_outputs, teacher_outputs):
        return distill_loss(student_outputs, teacher_outputs,
                            self.ce_temperature, self.ce_alpha)

    def compute_distill_loss(self, student_outputs, teacher_outputs=None):
        teacher_outputs = self.get_teachers_outputs(teacher_outputs)
        loss = self.compute_distill_loss_callback(student_outputs, teacher_outputs)
        self._output = None
        return loss

    def get_teachers_outputs(self, teacher_outputs=None):
        if teacher_outputs is None:
            teacher_outputs = self._output
        return teacher_outputs

    def forward_and_compute_distill_loss(self, x, student_outputs):
        """Fused path: teacher matmul + KL in one pallas_call (no HBM round trip
        of the teacher logits). Still caches the teacher output."""
        logits, loss = fused_teacher_forward_and_loss(
            x, self.w, self.b, student_outputs,
            temperature=self.ce_temperature, alpha=self.ce_alpha)
        self._output = jax.lax.stop_gradient(logits)
        return loss
    # TODO(synk): generic teacher modules (conv nets etc.) are not translated;
    # only a linear logits-head teacher is implemented in Pallas.


# ------------------------------------ main ------------------------------------

if __name__ == "__main__":
    B, H, C = 4, 32, 16  # batch, hidden, classes
    T, alpha = 2.0, 0.5

    key = jax.random.PRNGKey(0)
    kx, kw, kb, ks = jax.random.split(key, 4)
    x = jax.random.normal(kx, (B, H), dtype=jnp.float32)
    teacher_params = {
        "w": jax.random.normal(kw, (H, C), dtype=jnp.float32) * 0.1,
        "b": jax.random.normal(kb, (1, C), dtype=jnp.float32) * 0.1,
    }
    student_logits = jax.random.normal(ks, (B, C), dtype=jnp.float32)

    wrapper = TeacherWrapperPallas(teacher_params, ce_alpha=alpha, ce_temperature=T)

    # forward(): run teacher, cache output
    teacher_out = jax.block_until_ready(wrapper.forward(x))
    # compute_distill_loss(): KL against cached teacher output
    loss = jax.block_until_ready(wrapper.compute_distill_loss(student_logits))

    # fused single-kernel path
    wrapper2 = TeacherWrapperPallas(teacher_params, ce_alpha=alpha, ce_temperature=T)
    fused_loss = jax.block_until_ready(
        wrapper2.forward_and_compute_distill_loss(x, student_logits))
    fused_teacher_out = jax.block_until_ready(wrapper2.get_teachers_outputs())

    # ---- references ----
    ref_logits_f32 = x @ teacher_params["w"] + teacher_params["b"]
    # teacher matmul uses bf16 MXU inputs with f32 accumulation -> loose tol
    assert jnp.allclose(teacher_out, ref_logits_f32, atol=5e-2, rtol=5e-2), "teacher mismatch"
    assert jnp.allclose(fused_teacher_out, ref_logits_f32, atol=5e-2, rtol=5e-2), "fused teacher mismatch"

    # loss reference from the cached teacher logits (as the PyTorch wrapper does)
    log_p_s = jax.nn.log_softmax(student_logits / T, axis=-1)
    p_t = jax.nn.softmax(teacher_out / T, axis=-1)
    ref_loss = jnp.sum(p_t * (jnp.log(p_t) - log_p_s)) / B * T ** 2 * alpha
    assert jnp.allclose(loss, ref_loss, atol=1e-3, rtol=1e-2), "loss mismatch"
    assert jnp.allclose(fused_loss, ref_loss, atol=1e-3, rtol=1e-2), "fused loss mismatch"

    # gradient w.r.t. student logits via custom VJP
    g = jax.grad(lambda s: distill_loss(s, teacher_out, T, alpha))(student_logits)
    p_s = jax.nn.softmax(student_logits / T, axis=-1)
    ref_g = alpha * T / B * (p_s - p_t)
    assert jnp.allclose(g, ref_g, atol=1e-5, rtol=1e-4), "grad mismatch"

    print("KERNEL_OK")
</pallas_src>

<mosaic_0001>
module attributes {stable_mosaic.version = 11 : i64} {
  func.func @_teacher_linear_kernel(%arg0: i32, %arg1: i32, %arg2: i32, %arg3: memref<8x128xbf16, #tpu.memory_space<vmem>>, %arg4: memref<128x128xbf16, #tpu.memory_space<vmem>>, %arg5: memref<1x128xf32, #tpu.memory_space<vmem>>, %arg6: memref<8x128xf32, #tpu.memory_space<vmem>>, %arg7: memref<8x128xf32, #tpu.memory_space<vmem>>) attributes {dimension_semantics = [#tpu.dimension_semantics<parallel>, #tpu.dimension_semantics<parallel>, #tpu.dimension_semantics<arbitrary>], iteration_bounds = array<i64: 1, 1, 1>, scalar_prefetch = 0 : i64, scratch_operands = 1 : i64, tpu.core_type = #tpu.core_type<tc>, window_params = [{transform_indices = @transform_0, window_bounds = array<i64: 8, 128>}, {transform_indices = @transform_1, window_bounds = array<i64: 128, 128>}, {transform_indices = @transform_2, window_bounds = array<i64: 1, 128>}, {transform_indices = @transform_3, window_bounds = array<i64: 8, 128>}]} {
    %c0_i32 = arith.constant 0 : i32
    %0 = arith.cmpi eq, %arg2, %c0_i32 : i32
    %1 = arith.extui %0 : i1 to i32
    %c0_i32_0 = arith.constant 0 : i32
    %2 = arith.cmpi ne, %1, %c0_i32_0 : i32
    scf.if %2 {
      %cst_10 = arith.constant 0.000000e+00 : f32
      %12 = vector.broadcast %cst_10 : f32 to vector<8x128xf32>
      %c0_11 = arith.constant 0 : index
      %c0_12 = arith.constant 0 : index
      %13 = vector.load %arg7[%c0_11, %c0_12] : memref<8x128xf32, #tpu.memory_space<vmem>>, vector<8x128xf32>
      tpu.vector_store %arg7[%c0_11, %c0_12], %12 {strides = array<i32>} : memref<8x128xf32, #tpu.memory_space<vmem>>, vector<8x128xf32>,
    } else {
    }
    %c0 = arith.constant 0 : index
    %c0_1 = arith.constant 0 : index
    %3 = vector.load %arg7[%c0, %c0_1] : memref<8x128xf32, #tpu.memory_space<vmem>>, vector<8x128xf32>
    %c0_2 = arith.constant 0 : index
    %c0_3 = arith.constant 0 : index
    %4 = vector.load %arg3[%c0_2, %c0_3] : memref<8x128xbf16, #tpu.memory_space<vmem>>, vector<8x128xbf16>
    %c0_4 = arith.constant 0 : index
    %c0_5 = arith.constant 0 : index
    %5 = vector.load %arg4[%c0_4, %c0_5] : memref<128x128xbf16, #tpu.memory_space<vmem>>, vector<128x128xbf16>
    %cst = arith.constant dense<0.000000e+00> : vector<8x128xf32>
    %6 = tpu.matmul %4, %5, %cst {dimension_numbers = #tpu.dot_dimension_numbers<[1], [0], [0], [1], [0, 0, 1, 1], [], []>} : vector<8x128xbf16>, vector<128x128xbf16>, vector<8x128xf32> -> vector<8x128xf32>
    %7 = arith.addf %3, %6 : vector<8x128xf32>
    %c0_6 = arith.constant 0 : index
    %c0_7 = arith.constant 0 : index
    %8 = vector.load %arg7[%c0_6, %c0_7] : memref<8x128xf32, #tpu.memory_space<vmem>>, vector<8x128xf32>
    tpu.vector_store %arg7[%c0_6, %c0_7], %7 {strides = array<i32>} : memref<8x128xf32, #tpu.memory_space<vmem>>, vector<8x128xf32>,
    %c0_i32_8 = arith.constant 0 : i32
    %9 = arith.cmpi eq, %arg2, %c0_i32_8 : i32
    %10 = arith.extui %9 : i1 to i32
    %c0_i32_9 = arith.constant 0 : i32
    %11 = arith.cmpi ne, %10, %c0_i32_9 : i32
    scf.if %11 {
      %c0_10 = arith.constant 0 : index
      %c0_11 = arith.constant 0 : index
      %12 = vector.load %arg7[%c0_10, %c0_11] : memref<8x128xf32, #tpu.memory_space<vmem>>, vector<8x128xf32>
      %c0_12 = arith.constant 0 : index
      %c0_13 = arith.constant 0 : index
      %13 = vector.load %arg5[%c0_12, %c0_13] : memref<1x128xf32, #tpu.memory_space<vmem>>, vector<1x128xf32>
      %14 = vector.broadcast %13 : vector<1x128xf32> to vector<8x128xf32>
      %15 = arith.addf %12, %14 : vector<8x128xf32>
      %c0_14 = arith.constant 0 : index
      %c0_15 = arith.constant 0 : index
      %16 = vector.load %arg6[%c0_14, %c0_15] : memref<8x128xf32, #tpu.memory_space<vmem>>, vector<8x128xf32>
      tpu.vector_store %arg6[%c0_14, %c0_15], %15 {strides = array<i32>} : memref<8x128xf32, #tpu.memory_space<vmem>>, vector<8x128xf32>,
    } else {
    }
    return
  }
  func.func @transform_0(%arg0: i32, %arg1: i32, %arg2: i32) -> (i32, i32) {
    %c0_i32 = arith.constant 0 : i32
    return %arg0, %arg2 : i32, i32
  }
  func.func @transform_1(%arg0: i32, %arg1: i32, %arg2: i32) -> (i32, i32) {
    %c0_i32 = arith.constant 0 : i32
    return %arg2, %arg1 : i32, i32
  }
  func.func @transform_2(%arg0: i32, %arg1: i32, %arg2: i32) -> (i32, i32) {
    %c0_i32 = arith.constant 0 : i32
    %c0_i32_0 = arith.constant 0 : i32
    return %c0_i32, %arg1 : i32, i32
  }
  func.func @transform_3(%arg0: i32, %arg1: i32, %arg2: i32) -> (i32, i32) {
    %c0_i32 = arith.constant 0 : i32
    return %arg0, %arg1 : i32, i32
  }
}

</mosaic_0001>

<bundles_post_ra>
// kernel: tpu_custom_call.1
= control target key start
LH: loop header
LB: loop body
LE: loop exit
PB: predicated region body
PF: predicated region fallthrough
CT: control target
= control target key end

     0   :  { %8 = vsyncpa [#allocation4], 0  ;;  %s382_s0 = inlined_call_operand.hbm [shape: bf16[8,128], index: 0, kind: input, shape index: {}]   ;;  %s383_s1 = inlined_call_operand.hbm [shape: bf16[128,128], index: 1, kind: input, shape index: {}]   ;;  %s384_s2 = inlined_call_operand.vmem [shape: f32[1,128], index: 2, kind: input, shape index: {}]   ;;  %s385_s3 = inlined_call_operand.hbm [shape: f32[8,128], index: 3, kind: output, shape index: {}]  }
   0x1   :  { %9 = vsyncpa [#allocation7], 0 }
   0x2   :  { %10 = vsyncpa [#allocation5], 0  ;;  %s309_s12 = smov [#allocation3]   ;;  %s310_s14 = smov [#allocation6]  }
   0x3   :  { %s17_s13 = sshll.u32 %s309_s12, 4  ;;  %s26_s15 = sshll.u32 %s310_s14, 4  ;;  %s18_s13 = int_to_ptr.vmem [resolvable:$true] %s17_s13  ;;  %s336_s15 = int_to_ptr.vmem [resolvable:$true] %s26_s15 }
   0x4   :  { %s237_s18 = scalar_lea.hbm %s382_s0, 64 }
   0x5   :  { %p238_p0 = scmp.ne.s32.totalorder %s382_s0, %s237_s18  ;;  %p241_p1 = scmp.lt.u32.totalorder %s237_s18, %s382_s0 }
   0x7   :  { %p243_p2 = pnand %p241_p1, %p238_p0 }
   0x9   :  { %246 = shalt.err (!%p243_p2)
}
   0xa   :  { %s247_s23 = scalar_lea.vmem %s18_s13, 64  ;;  %p252_p4 = scmp.lt.s32.totalorder %s18_s13, %s18_s13 }
   0xb   :  { %p248_p3 = scmp.ne.s32.totalorder %s18_s13, %s247_s23  ;;  %p253_p5 = scmp.lt.s32.totalorder %s247_s23, %s247_s23 }
   0xd   :  { %p254_p6 = por %p253_p5, %p252_p4 }
   0xf   :  { %p255_p7 = pnand %p254_p6, %p248_p3 }
  0x11   :  { %258 = shalt.err (!%p255_p7)
}
  0x12   :  { %20 = dma.hbm_to_vmem [thread:$0]  %s382_s0, 64, %s18_s13, [#allocation4]  }
  0x13   :  { %s259_s28 = scalar_lea.hbm %s383_s1, 1024 }
  0x14   :  { %p260_p8 = scmp.ne.s32.totalorder %s383_s1, %s259_s28  ;;  %p263_p9 = scmp.lt.u32.totalorder %s259_s28, %s383_s1 }
  0x16   :  { %p265_p10 = pnand %p263_p9, %p260_p8 }
  0x18   :  { %268 = shalt.err (!%p265_p10)
}
  0x19   :  { %s269_s6 = scalar_lea.vmem %s336_s15, 1024  ;;  %p274_p12 = scmp.lt.s32.totalorder %s336_s15, %s336_s15 }
  0x1a   :  { %p270_p11 = scmp.ne.s32.totalorder %s336_s15, %s269_s6  ;;  %p275_p13 = scmp.lt.s32.totalorder %s269_s6, %s269_s6 }
  0x1c   :  { %p276_p0 = por %p275_p13, %p274_p12 }
  0x1e   :  { %p277_p1 = pnand %p276_p0, %p270_p11 }
  0x20   :  { %280 = shalt.err (!%p277_p1)
}
  0x21   :  { %s311_s0 = smov 64   ;;  %s312_s7 = smov 4  }
  0x22   :  { %32 = dma.hbm_to_vmem [thread:$0]  %s383_s1, 1024, %s336_s15, [#allocation7], %s311_s0, %s311_s0, %s312_s7  }
  0x23   :  { %303 = dma.done.wait [#allocation4], 64  }
  0x24   :  { %304 = vsyncadd [#allocation4], 4294967232 }
  0x25   :  { %305 = dma.done.wait [#allocation7], 1024  }
  0x26   :  { %306 = vsyncadd [#allocation7], 4294966272  ;;  %v313_v0 = vmov 0.0   ;;  %vm314_vm0 = vmmov 0   ;;  %v229_v1 = vld [vmem:[#allocation6] sm:$0xff]   ;;  %v230_v2 = vld [vmem:[#allocation6 + $0x8] sm:$0xff]  }
  0x27   :  { %202 = vmatprep.subr.bf16.mxu0 %v313_v0  ;;  %218 = vmatprep.mubr.msk.bf16.mxu0 %vm314_vm0, %v313_v0  ;;  %v231_v3 = vld [vmem:[#allocation6 + $0x10] sm:$0xff]   ;;  %v232_v4 = vld [vmem:[#allocation6 + $0x18] sm:$0xff]   ;;  %v233_v5 = vld [vmem:[#allocation6 + $0x20] sm:$0xff]   ;;  %s315_s11 = smov [#allocation8]  }
  0x28   :  { %203 = vmatpush3.bf16.msra.mxu0 %v229_v1  ;;  %v234_v6 = vld [vmem:[#allocation6 + $0x28] sm:$0xff]   ;;  %v235_v7 = vld [vmem:[#allocation6 + $0x30] sm:$0xff]   ;;  %v236_v8 = vld [vmem:[#allocation6 + $0x38] sm:$0xff]   ;;  %s174_s12 = sshll.u32 %s315_s11, 4  ;;  %s175_s12 = int_to_ptr.vmem [resolvable:$true] %s174_s12 }
  0x29   :  { %204 = vmatprep.subr.bf16.mxu0 %v313_v0  ;;  %v48_v9 = vld [vmem:[#allocation3] sm:$0xf]  ;;  %s281_s13 = scalar_lea.vmem %s175_s12, 128  ;;  %p286_p3 = scmp.lt.s32.totalorder %s175_s12, %s175_s12 }
  0x2a   :  { %v192_v10 = vld [vmem:[%s384_s2] ss:$0 sm:$0xff]  ;;  %p282_p2 = scmp.ne.s32.totalorder %s175_s12, %s281_s13  ;;  %p287_p4 = scmp.lt.s32.totalorder %s281_s13, %s281_s13 }
  0x2c   :  { %205 = vmatpush3.bf16.msra.mxu0 %v230_v2  ;;  %p288_p5 = por %p287_p4, %p286_p3 }
  0x2d   :  { %206 = vmatprep.subr.bf16.mxu0 %v313_v0 }
  0x2e   :  { %p289_p6 = pnand %p288_p5, %p282_p2 }
  0x30   :  { %207 = vmatpush3.bf16.msra.mxu0 %v231_v3 }
  0x31   :  { %208 = vmatprep.subr.bf16.mxu0 %v313_v0 }
  0x34   :  { %209 = vmatpush3.bf16.msra.mxu0 %v232_v4 }
  0x35   :  { %210 = vmatprep.subr.bf16.mxu0 %v313_v0 }
  0x38   :  { %211 = vmatpush3.bf16.msra.mxu0 %v233_v5 }
  0x39   :  { %212 = vmatprep.subr.bf16.mxu0 %v313_v0 }
  0x3c   :  { %213 = vmatpush3.bf16.msra.mxu0 %v234_v6 }
  0x3d   :  { %214 = vmatprep.subr.bf16.mxu0 %v313_v0 }
  0x40   :  { %215 = vmatpush3.bf16.msra.mxu0 %v235_v7 }
  0x41   :  { %216 = vmatprep.subr.bf16.mxu0 %v313_v0 }
  0x44   :  { %217 = vmatpush3.bf16.msra.mxu0 %v236_v8 }
  0x47   :  { %219 = vmatmul.mubr.bf16.vlgmr.msra.gmra.mrb[0].mxu0 %v48_v9 }
 0x11a   :  { %v147_v11 = vpop.f32.mrb[0].mxu0 }
 0x11b   :  { %v166_v12 = vadd.f32 %v192_v10, %v147_v11  ;;  %v220_v13 = vpop.f32.mrb[1].mxu0 }
 0x11c   :  { %v150_v14 = vpop.f32.mrb[2].mxu0 }
 0x11d   :  { %167 = vst [vmem:[#allocation8] sm:$0xff] %v166_v12  ;;  %v221_v15 = vpop.f32.mrb[3].mxu0 }
 0x11e   :  { %292 = shalt.err (!%p289_p6)
}
 0x11f   :  { %s293_s2 = scalar_lea.hbm %s385_s3, 128 }
 0x120   :  { %p294_p7 = scmp.ne.s32.totalorder %s385_s3, %s293_s2  ;;  %p297_p8 = scmp.lt.u32.totalorder %s293_s2, %s385_s3 }
 0x122   :  { %p299_p9 = pnand %p297_p8, %p294_p7 }
 0x124   :  { %302 = shalt.err (!%p299_p9)
}
 0x125   :  { %177 = dma.vmem_to_hbm [thread:$0]  %s175_s12, 128, %s385_s3, [#allocation5]  }
 0x126   :  { %307 = dma.done.wait [#allocation5], 128  }
 0x127   :  { %308 = vsyncadd [#allocation5], 4294967168 }
 0x128   :  { %181 = vsyncpa [#allocation4], 1 }
 0x129   :  { %182 = vsyncpa [#allocation7], 1 }
 0x12a   :  { %183 = vsyncpa [#allocation5], 1 }

</bundles_post_ra>
